<compile_context>
chip_gen: v5e
topology: v5e:2x2
jax: 0.10.0
libtpu: 0.0.40
codegen_flags: <defaults>
</compile_context>

<pallas_src>
import jax
import jax.numpy as jnp
from jax.experimental import pallas as pl
from jax.experimental.pallas import tpu as pltpu


def _linear_kernel(x_ref, wt_ref, b_ref, o_ref):
    # x_ref:  (TM, K) f32 activations
    # wt_ref: (K, N)  f32 weight (already transposed in the wrapper)
    # b_ref:  (1, N)  f32 bias
    # o_ref:  (TM, N) f32 output
    acc = jnp.dot(x_ref[...], wt_ref[...], preferred_element_type=jnp.float32)
    o_ref[...] = (acc + b_ref[...]).astype(o_ref.dtype)


def linear_pallas(x2d, weight, bias, *, num_tiles=1):
    """x2d: (M, K) f32, weight: (N, K) torch layout, bias: (N,) -> (M, N) f32.

    num_tiles=1 (default): single block, best on v5e/v6e (1 TC, grid is a
    serial loop).  num_tiles=2 gives two balanced tiles for v7x megacore.
    """
    M, K = x2d.shape
    N = weight.shape[0]
    assert M % num_tiles == 0, (M, num_tiles)
    tile_m = M // num_tiles

    # One tiny transpose; folds inside the surrounding jit and is reusable
    # across calls.  Kernel then contracts on dim 0 of the (K, N) operand,
    # avoiding any per-call XLU transpose of the resident weight block.
    w_t = jnp.transpose(weight).astype(jnp.float32)      # (K, N)
    b2 = bias.reshape(1, N).astype(jnp.float32)          # (1, N)

    cost = pl.CostEstimate(
        flops=2 * M * N * K,
        transcendentals=0,
        bytes_accessed=(M * K * 4) + (K * N * 4) + (N * 4) + (M * N * 4),
    )

    return pl.pallas_call(
        _linear_kernel,
        out_shape=jax.ShapeDtypeStruct((M, N), jnp.float32),
        grid_spec=pl.GridSpec(
            grid=(num_tiles,),
            in_specs=[
                pl.BlockSpec((tile_m, K), lambda i: (i, 0)),   # activations (tiled on M)
                pl.BlockSpec((K, N), lambda i: (0, 0)),        # weight: resident
                pl.BlockSpec((1, N), lambda i: (0, 0)),        # bias: resident
            ],
            out_specs=pl.BlockSpec((tile_m, N), lambda i: (i, 0)),
        ),
        compiler_params=pltpu.CompilerParams(
            dimension_semantics=("parallel",),
        ),
        cost_estimate=cost,
    )(x2d.astype(jnp.float32), w_t, b2)


@jax.jit
def forward(x267, weight, bias):
    # x267: (1, 384, 4, 64) -> contiguous view (384, 256) -> Linear -> (1, 384, 256)
    B, S = x267.shape[0], x267.shape[1]
    x2d = x267.reshape(B * S, 256)       # contiguous bitcast; folds inside jit
    y2d = linear_pallas(x2d, weight, bias)
    return y2d.reshape(B, S, 256)


if __name__ == "__main__":
    key = jax.random.PRNGKey(0)
    k_x, k_w, k_b = jax.random.split(key, 3)

    # Input matching the module's shapes.
    x267 = jax.random.normal(k_x, (1, 384, 4, 64), dtype=jnp.float32)

    # Deterministic Linear(256, 256) parameter init (uniform like torch default).
    in_features, out_features = 256, 256
    bound = 1.0 / (in_features ** 0.5)
    weight = jax.random.uniform(
        k_w, (out_features, in_features), minval=-bound, maxval=bound,
        dtype=jnp.float32)
    bias = jax.random.uniform(
        k_b, (out_features,), minval=-bound, maxval=bound, dtype=jnp.float32)

    out = forward(x267, weight, bias)
    out = jax.block_until_ready(out)

    # Sanity check vs plain-JAX f32 reference (all-f32 path -> tight tolerance).
    ref = x267.reshape(1, 384, 256) @ weight.T + bias
    assert out.shape == (1, 384, 256)
    assert jnp.allclose(out, ref, atol=1e-3, rtol=1e-3)

    print("KERNEL_OK")
</pallas_src>

<mosaic_0001>
module attributes {stable_mosaic.version = 11 : i64} {
  func.func @_linear_kernel(%arg0: i32, %arg1: memref<384x256xf32, #tpu.memory_space<vmem>>, %arg2: memref<256x256xf32, #tpu.memory_space<vmem>>, %arg3: memref<1x256xf32, #tpu.memory_space<vmem>>, %arg4: memref<384x256xf32, #tpu.memory_space<vmem>>) attributes {dimension_semantics = [#tpu.dimension_semantics<parallel>], iteration_bounds = array<i64: 1>, scalar_prefetch = 0 : i64, scratch_operands = 0 : i64, tpu.core_type = #tpu.core_type<tc>, window_params = [{transform_indices = @transform_0, window_bounds = array<i64: 384, 256>}, {pipeline_mode = #tpu.pipeline_mode<synchronous>, transform_indices = @transform_1, window_bounds = array<i64: 256, 256>}, {pipeline_mode = #tpu.pipeline_mode<synchronous>, transform_indices = @transform_2, window_bounds = array<i64: 1, 256>}, {transform_indices = @transform_3, window_bounds = array<i64: 384, 256>}]} {
    %c0 = arith.constant 0 : index
    %c0_0 = arith.constant 0 : index
    %0 = vector.load %arg1[%c0, %c0_0] : memref<384x256xf32, #tpu.memory_space<vmem>>, vector<384x256xf32>
    %c0_1 = arith.constant 0 : index
    %c0_2 = arith.constant 0 : index
    %1 = vector.load %arg2[%c0_1, %c0_2] : memref<256x256xf32, #tpu.memory_space<vmem>>, vector<256x256xf32>
    %cst = arith.constant dense<0.000000e+00> : vector<384x256xf32>
    %2 = tpu.matmul %0, %1, %cst {dimension_numbers = #tpu.dot_dimension_numbers<[1], [0], [0], [1], [0, 0, 1, 1], [], []>} : vector<384x256xf32>, vector<256x256xf32>, vector<384x256xf32> -> vector<384x256xf32>
    %c0_3 = arith.constant 0 : index
    %c0_4 = arith.constant 0 : index
    %3 = vector.load %arg3[%c0_3, %c0_4] : memref<1x256xf32, #tpu.memory_space<vmem>>, vector<1x256xf32>
    %4 = vector.broadcast %3 : vector<1x256xf32> to vector<384x256xf32>
    %5 = arith.addf %2, %4 : vector<384x256xf32>
    %c0_5 = arith.constant 0 : index
    %c0_6 = arith.constant 0 : index
    %6 = vector.load %arg4[%c0_5, %c0_6] : memref<384x256xf32, #tpu.memory_space<vmem>>, vector<384x256xf32>
    tpu.vector_store %arg4[%c0_5, %c0_6], %5 {strides = array<i32>} : memref<384x256xf32, #tpu.memory_space<vmem>>, vector<384x256xf32>,
    return
  }
  func.func @transform_0(%arg0: i32) -> (i32, i32) {
    %c0_i32 = arith.constant 0 : i32
    %c0_i32_0 = arith.constant 0 : i32
    return %arg0, %c0_i32 : i32, i32
  }
  func.func @transform_1(%arg0: i32) -> (i32, i32) {
    %c0_i32 = arith.constant 0 : i32
    %c0_i32_0 = arith.constant 0 : i32
    %c0_i32_1 = arith.constant 0 : i32
    return %c0_i32, %c0_i32_0 : i32, i32
  }
  func.func @transform_2(%arg0: i32) -> (i32, i32) {
    %c0_i32 = arith.constant 0 : i32
    %c0_i32_0 = arith.constant 0 : i32
    %c0_i32_1 = arith.constant 0 : i32
    return %c0_i32, %c0_i32_0 : i32, i32
  }
  func.func @transform_3(%arg0: i32) -> (i32, i32) {
    %c0_i32 = arith.constant 0 : i32
    %c0_i32_0 = arith.constant 0 : i32
    return %arg0, %c0_i32 : i32, i32
  }
}

</mosaic_0001>

<bundles_post_ra>
// kernel: forward.1
= control target key start
LH: loop header
LB: loop body
LE: loop exit
PB: predicated region body
PF: predicated region fallthrough
CT: control target
= control target key end

     0   :  { %s1577_s0 = inlined_call_operand.vmem [shape: f32[384,256], index: 0, kind: input, shape index: {}]   ;;  %s1578_s1 = inlined_call_operand.vmem [shape: f32[256,256], index: 1, kind: input, shape index: {}]   ;;  %s1579_s2 = inlined_call_operand.vmem [shape: f32[1,256], index: 2, kind: input, shape index: {}]   ;;  %s1580_s3 = inlined_call_operand.hbm [shape: f32[384,256], index: 3, kind: output, shape index: {}]  }
   0x1   :  { %v142_v0 = vld [vmem:[%s1578_s1 + $0xf8] sm:$0xff]  ;;  %v140_v1 = vld [vmem:[%s1578_s1 + $0xe8] sm:$0xff]  ;;  %v141_v4 = vld [vmem:[%s1578_s1 + $0xf0] sm:$0xff] }
   0x2   :  { %v174_v2 = vld [vmem:[%s1578_s1 + $0x1f8] sm:$0xff]  ;;  %503 = vmatpush.msra.mxu2 %v142_v0  ;;  %v172_v3 = vld [vmem:[%s1578_s1 + $0x1e8] sm:$0xff]  ;;  %181 = vmatpush.msra.mxu0 %v141_v4  ;;  %v139_v7 = vld [vmem:[%s1578_s1 + $0xe0] sm:$0xff] }
   0x3   :  { %664 = vmatpush.msra.mxu3 %v174_v2  ;;  %v138_v5 = vld [vmem:[%s1578_s1 + $0xd8] sm:$0xff]  ;;  %v136_v8 = vld [vmem:[%s1578_s1 + $0xc8] sm:$0xff]  ;;  %v173_v9 = vld [vmem:[%s1578_s1 + $0x1f0] sm:$0xff] }
   0x4   :  { %v170_v6 = vld [vmem:[%s1578_s1 + $0x1d8] sm:$0xff]  ;;  %504 = vmatpush.msra.mxu2 %v140_v1  ;;  %182 = vmatpush.msra.mxu0 %v139_v7  ;;  %v168_v10 = vld [vmem:[%s1578_s1 + $0x1c8] sm:$0xff]  ;;  %v137_v11 = vld [vmem:[%s1578_s1 + $0xd0] sm:$0xff] }
   0x5   :  { %665 = vmatpush.msra.mxu3 %v172_v3  ;;  %342 = vmatpush.msra.mxu1 %v173_v9  ;;  %v171_v12 = vld [vmem:[%s1578_s1 + $0x1e0] sm:$0xff]  ;;  %v169_v14 = vld [vmem:[%s1578_s1 + $0x1d0] sm:$0xff]  ;;  %v134_v15 = vld [vmem:[%s1578_s1 + $0xb8] sm:$0xff] }
   0x6   :  { %505 = vmatpush.msra.mxu2 %v138_v5  ;;  %v135_v13 = vld [vmem:[%s1578_s1 + $0xc0] sm:$0xff]  ;;  %183 = vmatpush.msra.mxu0 %v137_v11  ;;  %v166_v16 = vld [vmem:[%s1578_s1 + $0x1b8] sm:$0xff]  ;;  %v133_v17 = vld [vmem:[%s1578_s1 + $0xb0] sm:$0xff] }
   0x7   :  { %666 = vmatpush.msra.mxu3 %v170_v6  ;;  %343 = vmatpush.msra.mxu1 %v171_v12  ;;  %v167_v18 = vld [vmem:[%s1578_s1 + $0x1c0] sm:$0xff]  ;;  %v132_v19 = vld [vmem:[%s1578_s1 + $0xa8] sm:$0xff]  ;;  %v165_v22 = vld [vmem:[%s1578_s1 + $0x1b0] sm:$0xff] }
   0x8   :  { %506 = vmatpush.msra.mxu2 %v136_v8  ;;  %184 = vmatpush.msra.mxu0 %v135_v13  ;;  %v164_v20 = vld [vmem:[%s1578_s1 + $0x1a8] sm:$0xff]  ;;  %v131_v21 = vld [vmem:[%s1578_s1 + $0xa0] sm:$0xff]  ;;  %v130_v23 = vld [vmem:[%s1578_s1 + $0x98] sm:$0xff] }
   0x9   :  { %667 = vmatpush.msra.mxu3 %v168_v10  ;;  %344 = vmatpush.msra.mxu1 %v169_v14  ;;  %v162_v24 = vld [vmem:[%s1578_s1 + $0x198] sm:$0xff]  ;;  %v129_v25 = vld [vmem:[%s1578_s1 + $0x90] sm:$0xff]  ;;  %v163_v26 = vld [vmem:[%s1578_s1 + $0x1a0] sm:$0xff] }
   0xa   :  { %507 = vmatpush.msra.mxu2 %v134_v15  ;;  %185 = vmatpush.msra.mxu0 %v133_v17  ;;  %v128_v27 = vld [vmem:[%s1578_s1 + $0x88] sm:$0xff]  ;;  %v127_v29 = vld [vmem:[%s1578_s1 + $0x80] sm:$0xff]  ;;  %v161_v30 = vld [vmem:[%s1578_s1 + $0x190] sm:$0xff] }
   0xb   :  { %668 = vmatpush.msra.mxu3 %v166_v16  ;;  %345 = vmatpush.msra.mxu1 %v167_v18  ;;  %v160_v28 = vld [vmem:[%s1578_s1 + $0x188] sm:$0xff]  ;;  %v126_v31 = vld [vmem:[%s1578_s1 + $0x78] sm:$0xff]  ;;  %v125_v33 = vld [vmem:[%s1578_s1 + $0x70] sm:$0xff] }
   0xc   :  { %508 = vmatpush.msra.mxu2 %v132_v19  ;;  %186 = vmatpush.msra.mxu0 %v131_v21  ;;  %v158_v32 = vld [vmem:[%s1578_s1 + $0x178] sm:$0xff]  ;;  %v159_v34 = vld [vmem:[%s1578_s1 + $0x180] sm:$0xff]  ;;  %v124_v35 = vld [vmem:[%s1578_s1 + $0x68] sm:$0xff] }
   0xd   :  { %669 = vmatpush.msra.mxu3 %v164_v20  ;;  %346 = vmatpush.msra.mxu1 %v165_v22  ;;  %v156_v36 = vld [vmem:[%s1578_s1 + $0x168] sm:$0xff]  ;;  %v123_v37 = vld [vmem:[%s1578_s1 + $0x60] sm:$0xff]  ;;  %v157_v38 = vld [vmem:[%s1578_s1 + $0x170] sm:$0xff] }
   0xe   :  { %509 = vmatpush.msra.mxu2 %v130_v23  ;;  %187 = vmatpush.msra.mxu0 %v129_v25  ;;  %v122_v39 = vld [vmem:[%s1578_s1 + $0x58] sm:$0xff]  ;;  %v121_v41 = vld [vmem:[%s1578_s1 + $0x50] sm:$0xff]  ;;  %v155_v42 = vld [vmem:[%s1578_s1 + $0x160] sm:$0xff] }
   0xf   :  { %670 = vmatpush.msra.mxu3 %v162_v24  ;;  %347 = vmatpush.msra.mxu1 %v163_v26  ;;  %v154_v40 = vld [vmem:[%s1578_s1 + $0x158] sm:$0xff]  ;;  %v120_v43 = vld [vmem:[%s1578_s1 + $0x48] sm:$0xff]  ;;  %v119_v45 = vld [vmem:[%s1578_s1 + $0x40] sm:$0xff] }
  0x10   :  { %510 = vmatpush.msra.mxu2 %v128_v27  ;;  %188 = vmatpush.msra.mxu0 %v127_v29  ;;  %v152_v44 = vld [vmem:[%s1578_s1 + $0x148] sm:$0xff]  ;;  %v153_v46 = vld [vmem:[%s1578_s1 + $0x150] sm:$0xff]  ;;  %v118_v47 = vld [vmem:[%s1578_s1 + $0x38] sm:$0xff] }
  0x11   :  { %671 = vmatpush.msra.mxu3 %v160_v28  ;;  %348 = vmatpush.msra.mxu1 %v161_v30  ;;  %v150_v48 = vld [vmem:[%s1578_s1 + $0x138] sm:$0xff]  ;;  %v117_v49 = vld [vmem:[%s1578_s1 + $0x30] sm:$0xff]  ;;  %v151_v50 = vld [vmem:[%s1578_s1 + $0x140] sm:$0xff] }
  0x12   :  { %511 = vmatpush.msra.mxu2 %v126_v31  ;;  %189 = vmatpush.msra.mxu0 %v125_v33 }
  0x13   :  { %672 = vmatpush.msra.mxu3 %v158_v32  ;;  %349 = vmatpush.msra.mxu1 %v159_v34 }
  0x14   :  { %512 = vmatpush.msra.mxu2 %v124_v35  ;;  %190 = vmatpush.msra.mxu0 %v123_v37 }
  0x15   :  { %673 = vmatpush.msra.mxu3 %v156_v36  ;;  %350 = vmatpush.msra.mxu1 %v157_v38 }
  0x16   :  { %513 = vmatpush.msra.mxu2 %v122_v39  ;;  %191 = vmatpush.msra.mxu0 %v121_v41 }
  0x17   :  { %674 = vmatpush.msra.mxu3 %v154_v40  ;;  %351 = vmatpush.msra.mxu1 %v155_v42 }
  0x18   :  { %514 = vmatpush.msra.mxu2 %v120_v43 }
  0x19   :  { %675 = vmatpush.msra.mxu3 %v152_v44 }
  0x1a   :  { %8 = vsyncpa [#allocation3], 0  ;;  %v116_v51 = vld [vmem:[%s1578_s1 + $0x28] sm:$0xff]  ;;  %192 = vmatpush.msra.mxu0 %v119_v45  ;;  %352 = vmatpush.msra.mxu1 %v153_v46  ;;  %v115_v53 = vld [vmem:[%s1578_s1 + $0x20] sm:$0xff]  ;;  %s927_s28 = sshll.u32 %s1580_s3, 4  ;;  %s969_s29 = smov 256   ;;  %s928_s28 = int_to_ptr.hbm [resolvable:$true] %s927_s28 }
  0x1b   :  { %v148_v52 = vld [vmem:[%s1578_s1 + $0x128] sm:$0xff]  ;;  %515 = vmatpush.msra.mxu2 %v118_v47  ;;  %676 = vmatpush.msra.mxu3 %v150_v48  ;;  %v149_v54 = vld [vmem:[%s1578_s1 + $0x130] sm:$0xff]  ;;  %v114_v55 = vld [vmem:[%s1578_s1 + $0x18] sm:$0xff]  ;;  %s970_s30 = smov 16  }
  0x1c   :  { %193 = vmatpush.msra.mxu0 %v117_v49  ;;  %353 = vmatpush.msra.mxu1 %v151_v50  ;;  %v146_v56 = vld [vmem:[%s1578_s1 + $0x118] sm:$0xff]  ;;  %v113_v57 = vld [vmem:[%s1578_s1 + $0x10] sm:$0xff]  ;;  %v147_v58 = vld [vmem:[%s1578_s1 + $0x120] sm:$0xff] }
  0x1d   :  { %516 = vmatpush.msra.mxu2 %v116_v51  ;;  %677 = vmatpush.msra.mxu3 %v148_v52  ;;  %v112_v59 = vld [vmem:[%s1578_s1 + $0x8] sm:$0xff]  ;;  %v15_v61 = vld [vmem:[%s1577_s0] sm:$0xff]  ;;  %v145_v0 = vld [vmem:[%s1578_s1 + $0x110] sm:$0xff] }
  0x1e   :  { %194 = vmatpush.msra.mxu0 %v115_v53  ;;  %354 = vmatpush.msra.mxu1 %v149_v54  ;;  %v144_v60 = vld [vmem:[%s1578_s1 + $0x108] sm:$0xff]  ;;  %v111_v63 = vld [vmem:[%s1578_s1] sm:$0xff]  ;;  %v17_v2 = vld [vmem:[%s1577_s0 + $0x10] sm:$0xff] }
  0x1f   :  { %517 = vmatpush.msra.mxu2 %v114_v55  ;;  %678 = vmatpush.msra.mxu3 %v146_v56  ;;  %v16_v62 = vld [vmem:[%s1577_s0 + $0x8] sm:$0xff]  ;;  %v143_v1 = vld [vmem:[%s1578_s1 + $0x100] sm:$0xff]  ;;  %v18_v3 = vld [vmem:[%s1577_s0 + $0x18] sm:$0xff] }
  0x20   :  { %195 = vmatpush.msra.mxu0 %v113_v57  ;;  %355 = vmatpush.msra.mxu1 %v147_v58  ;;  %v19_v4 = vld [vmem:[%s1577_s0 + $0x20] sm:$0xff]  ;;  %v20_v5 = vld [vmem:[%s1577_s0 + $0x28] sm:$0xff]  ;;  %v21_v6 = vld [vmem:[%s1577_s0 + $0x30] sm:$0xff] }
  0x21   :  { %518 = vmatpush.msra.mxu2 %v112_v59  ;;  %679 = vmatpush.msra.mxu3 %v144_v60  ;;  %v22_v7 = vld [vmem:[%s1577_s0 + $0x38] sm:$0xff]  ;;  %v23_v8 = vld [vmem:[%s1577_s0 + $0x40] sm:$0xff]  ;;  %v24_v9 = vld [vmem:[%s1577_s0 + $0x48] sm:$0xff] }
  0x22   :  { %519 = vmatmul.f32.vlgmr.msra.gmra.mxu2 %v15_v61  ;;  %680 = vmatmul.f32.vlgmr.msra.gmra.mxu3 %v16_v62  ;;  %v25_v10 = vld [vmem:[%s1577_s0 + $0x50] sm:$0xff]  ;;  %v26_v11 = vld [vmem:[%s1577_s0 + $0x58] sm:$0xff]  ;;  %v27_v12 = vld [vmem:[%s1577_s0 + $0x60] sm:$0xff] }
  0x23   :  { %196 = vmatpush.msra.mxu0 %v111_v63  ;;  %356 = vmatpush.msra.mxu1 %v145_v0  ;;  %v28_v13 = vld [vmem:[%s1577_s0 + $0x68] sm:$0xff]  ;;  %v29_v14 = vld [vmem:[%s1577_s0 + $0x70] sm:$0xff]  ;;  %v30_v15 = vld [vmem:[%s1577_s0 + $0x78] sm:$0xff] }
  0x24   :  { %197 = vmatmul.f32.vlgmr.msra.gmra.mxu0 %v15_v61  ;;  %v31_v16 = vld [vmem:[%s1577_s0 + $0x80] sm:$0xff]  ;;  %v32_v17 = vld [vmem:[%s1577_s0 + $0x88] sm:$0xff]  ;;  %v33_v18 = vld [vmem:[%s1577_s0 + $0x90] sm:$0xff] }
  0x25   :  { %357 = vmatpush.msra.mxu1 %v143_v1  ;;  %v34_v19 = vld [vmem:[%s1577_s0 + $0x98] sm:$0xff]  ;;  %v35_v20 = vld [vmem:[%s1577_s0 + $0xa0] sm:$0xff]  ;;  %v36_v21 = vld [vmem:[%s1577_s0 + $0xa8] sm:$0xff] }
  0x26   :  { %358 = vmatmul.f32.vlgmr.msra.gmra.mxu1 %v16_v62  ;;  %v37_v22 = vld [vmem:[%s1577_s0 + $0xb0] sm:$0xff]  ;;  %v38_v23 = vld [vmem:[%s1577_s0 + $0xb8] sm:$0xff]  ;;  %v39_v24 = vld [vmem:[%s1577_s0 + $0xc0] sm:$0xff] }
  0x27   :  { %v40_v25 = vld [vmem:[%s1577_s0 + $0xc8] sm:$0xff]  ;;  %v41_v26 = vld [vmem:[%s1577_s0 + $0xd0] sm:$0xff]  ;;  %v42_v27 = vld [vmem:[%s1577_s0 + $0xd8] sm:$0xff] }
  0x28   :  { %v43_v28 = vld [vmem:[%s1577_s0 + $0xe0] sm:$0xff]  ;;  %v44_v29 = vld [vmem:[%s1577_s0 + $0xe8] sm:$0xff]  ;;  %v45_v30 = vld [vmem:[%s1577_s0 + $0xf0] sm:$0xff] }
  0x29   :  { %v46_v31 = vld [vmem:[%s1577_s0 + $0xf8] sm:$0xff]  ;;  %v175_v32 = vld [vmem:[%s1579_s2] sm:$0x3]  ;;  %v48_v35 = vld [vmem:[%s1577_s0 + $0x108] sm:$0xff] }
  0x2a   :  { %522 = vmatmul.f32.gmra.mxu2 %v17_v2  ;;  %683 = vmatmul.f32.gmra.mxu3 %v18_v3  ;;  %v1282_v33 = vperm.slane %v175_v32, 0  ;;  %v47_v34 = vld [vmem:[%s1577_s0 + $0x100] sm:$0xff]  ;;  %v1291_v38 = vperm.slane %v175_v32, 1  ;;  %v49_v44 = vld [vmem:[%s1577_s0 + $0x110] sm:$0xff]  ;;  %v50_v45 = vld [vmem:[%s1577_s0 + $0x118] sm:$0xff] }
  0x2b   :  { %v51_v54 = vld [vmem:[%s1577_s0 + $0x120] sm:$0xff]  ;;  %v52_v55 = vld [vmem:[%s1577_s0 + $0x128] sm:$0xff]  ;;  %v53_v0 = vld [vmem:[%s1577_s0 + $0x130] sm:$0xff] }
  0x2c   :  { %200 = vmatmul.f32.gmra.mxu0 %v17_v2  ;;  %v54_v1 = vld [vmem:[%s1577_s0 + $0x138] sm:$0xff] }
  0x2e   :  { %361 = vmatmul.f32.gmra.mxu1 %v18_v3 }
  0x32   :  { %525 = vmatmul.f32.gmra.mxu2 %v19_v4  ;;  %686 = vmatmul.f32.gmra.mxu3 %v20_v5 }
  0x34   :  { %203 = vmatmul.f32.gmra.mxu0 %v19_v4 }
  0x36   :  { %364 = vmatmul.f32.gmra.mxu1 %v20_v5 }
  0x3a   :  { %528 = vmatmul.f32.gmra.mxu2 %v21_v6  ;;  %689 = vmatmul.f32.gmra.mxu3 %v22_v7 }
  0x3c   :  { %206 = vmatmul.f32.gmra.mxu0 %v21_v6 }
  0x3e   :  { %367 = vmatmul.f32.gmra.mxu1 %v22_v7 }
  0x42   :  { %531 = vmatmul.f32.gmra.mxu2 %v23_v8  ;;  %692 = vmatmul.f32.gmra.mxu3 %v24_v9 }
  0x44   :  { %209 = vmatmul.f32.gmra.mxu0 %v23_v8 }
  0x46   :  { %370 = vmatmul.f32.gmra.mxu1 %v24_v9 }
  0x4a   :  { %534 = vmatmul.f32.gmra.mxu2 %v25_v10  ;;  %695 = vmatmul.f32.gmra.mxu3 %v26_v11 }
  0x4c   :  { %212 = vmatmul.f32.gmra.mxu0 %v25_v10  ;;  %v55_v10 = vld [vmem:[%s1577_s0 + $0x140] sm:$0xff] }
  0x4e   :  { %373 = vmatmul.f32.gmra.mxu1 %v26_v11  ;;  %v56_v11 = vld [vmem:[%s1577_s0 + $0x148] sm:$0xff] }
  0x52   :  { %537 = vmatmul.f32.gmra.mxu2 %v27_v12  ;;  %698 = vmatmul.f32.gmra.mxu3 %v28_v13 }
  0x54   :  { %215 = vmatmul.f32.gmra.mxu0 %v27_v12 }
  0x56   :  { %376 = vmatmul.f32.gmra.mxu1 %v28_v13 }
  0x5a   :  { %540 = vmatmul.f32.gmra.mxu2 %v29_v14  ;;  %701 = vmatmul.f32.gmra.mxu3 %v30_v15 }
  0x5c   :  { %218 = vmatmul.f32.gmra.mxu0 %v29_v14 }
  0x5e   :  { %379 = vmatmul.f32.gmra.mxu1 %v30_v15 }
  0x62   :  { %543 = vmatmul.f32.gmra.mxu2 %v31_v16  ;;  %704 = vmatmul.f32.gmra.mxu3 %v32_v17 }
  0x64   :  { %221 = vmatmul.f32.gmra.mxu0 %v31_v16 }
  0x66   :  { %382 = vmatmul.f32.gmra.mxu1 %v32_v17 }
  0x6a   :  { %546 = vmatmul.f32.gmra.mxu2 %v33_v18  ;;  %707 = vmatmul.f32.gmra.mxu3 %v34_v19 }
  0x6c   :  { %224 = vmatmul.f32.gmra.mxu0 %v33_v18 }
  0x6e   :  { %385 = vmatmul.f32.gmra.mxu1 %v34_v19 }
  0x72   :  { %549 = vmatmul.f32.gmra.mxu2 %v35_v20  ;;  %710 = vmatmul.f32.gmra.mxu3 %v36_v21 }
  0x74   :  { %227 = vmatmul.f32.gmra.mxu0 %v35_v20  ;;  %v57_v20 = vld [vmem:[%s1577_s0 + $0x150] sm:$0xff] }
  0x76   :  { %388 = vmatmul.f32.gmra.mxu1 %v36_v21  ;;  %v58_v21 = vld [vmem:[%s1577_s0 + $0x158] sm:$0xff] }
  0x7a   :  { %552 = vmatmul.f32.gmra.mxu2 %v37_v22  ;;  %713 = vmatmul.f32.gmra.mxu3 %v38_v23 }
  0x7c   :  { %230 = vmatmul.f32.gmra.mxu0 %v37_v22 }
  0x7e   :  { %391 = vmatmul.f32.gmra.mxu1 %v38_v23 }
  0x82   :  { %555 = vmatmul.f32.gmra.mxu2 %v39_v24  ;;  %716 = vmatmul.f32.gmra.mxu3 %v40_v25 }
  0x84   :  { %233 = vmatmul.f32.gmra.mxu0 %v39_v24 }
  0x86   :  { %394 = vmatmul.f32.gmra.mxu1 %v40_v25 }
  0x8a   :  { %558 = vmatmul.f32.gmra.mxu2 %v41_v26  ;;  %719 = vmatmul.f32.gmra.mxu3 %v42_v27 }
  0x8c   :  { %236 = vmatmul.f32.gmra.mxu0 %v41_v26 }
  0x8e   :  { %397 = vmatmul.f32.gmra.mxu1 %v42_v27 }
  0x92   :  { %561 = vmatmul.f32.gmra.mxu2 %v43_v28  ;;  %722 = vmatmul.f32.gmra.mxu3 %v44_v29 }
  0x94   :  { %239 = vmatmul.f32.gmra.mxu0 %v43_v28 }
  0x96   :  { %400 = vmatmul.f32.gmra.mxu1 %v44_v29 }
  0x9a   :  { %564 = vmatmul.f32.gmra.mxu2 %v45_v30  ;;  %725 = vmatmul.f32.gmra.mxu3 %v46_v31 }
  0x9c   :  { %242 = vmatmul.f32.gmra.mxu0 %v45_v30  ;;  %v59_v30 = vld [vmem:[%s1577_s0 + $0x160] sm:$0xff] }
  0x9e   :  { %403 = vmatmul.f32.gmra.mxu1 %v46_v31  ;;  %v60_v31 = vld [vmem:[%s1577_s0 + $0x168] sm:$0xff] }
  0xa1   :  { %v198_v36 = vpop.f32.mrf.mxu0 }
  0xa2   :  { %567 = vmatmul.f32.gmra.mxu2 %v47_v34  ;;  %728 = vmatmul.f32.gmra.mxu3 %v48_v35  ;;  %v199_v37 = vadd.f32 %v198_v36, %v1282_v33 }
  0xa3   :  { %v359_v39 = vpop.f32.mrf.mxu1 }
  0xa4   :  { %v360_v40 = vadd.f32 %v359_v39, %v199_v37  ;;  %245 = vmatmul.f32.gmra.mxu0 %v47_v34 }
  0xa5   :  { %v520_v41 = vpop.f32.mrf.mxu2  ;;  %v681_v42 = vpop.f32.mrf.mxu3 }
  0xa6   :  { %v521_v43 = vadd.f32 %v520_v41, %v1291_v38  ;;  %825 = vst [vmem:[#allocation2] sm:$0xff] %v360_v40  ;;  %406 = vmatmul.f32.gmra.mxu1 %v48_v35 }
  0xa8   :  { %v682_v46 = vadd.f32 %v681_v42, %v521_v43  ;;  %v61_v42 = vld [vmem:[%s1577_s0 + $0x170] sm:$0xff]  ;;  %v62_v43 = vld [vmem:[%s1577_s0 + $0x178] sm:$0xff] }
  0xa9   :  { %v201_v47 = vpop.f32.mrf.mxu0 }
  0xaa   :  { %826 = vst [vmem:[#allocation2 + $0x8] sm:$0xff] %v682_v46  ;;  %570 = vmatmul.f32.gmra.mxu2 %v49_v44  ;;  %731 = vmatmul.f32.gmra.mxu3 %v50_v45  ;;  %v202_v48 = vadd.f32 %v201_v47, %v1282_v33 }
  0xab   :  { %v362_v49 = vpop.f32.mrf.mxu1 }
  0xac   :  { %v363_v50 = vadd.f32 %v362_v49, %v202_v48  ;;  %248 = vmatmul.f32.gmra.mxu0 %v49_v44 }
  0xad   :  { %v523_v51 = vpop.f32.mrf.mxu2  ;;  %v684_v52 = vpop.f32.mrf.mxu3 }
  0xae   :  { %v524_v53 = vadd.f32 %v523_v51, %v1291_v38  ;;  %827 = vst [vmem:[#allocation2 + $0x10] sm:$0xff] %v363_v50  ;;  %409 = vmatmul.f32.gmra.mxu1 %v50_v45 }
  0xb0   :  { %v685_v56 = vadd.f32 %v684_v52, %v524_v53  ;;  %v63_v52 = vld [vmem:[%s1577_s0 + $0x180] sm:$0xff]  ;;  %v64_v53 = vld [vmem:[%s1577_s0 + $0x188] sm:$0xff] }
  0xb1   :  { %v204_v57 = vpop.f32.mrf.mxu0 }
  0xb2   :  { %828 = vst [vmem:[#allocation2 + $0x18] sm:$0xff] %v685_v56  ;;  %573 = vmatmul.f32.gmra.mxu2 %v51_v54  ;;  %734 = vmatmul.f32.gmra.mxu3 %v52_v55  ;;  %v205_v58 = vadd.f32 %v204_v57, %v1282_v33 }
  0xb3   :  { %v365_v59 = vpop.f32.mrf.mxu1 }
  0xb4   :  { %v366_v60 = vadd.f32 %v365_v59, %v205_v58  ;;  %251 = vmatmul.f32.gmra.mxu0 %v51_v54 }
  0xb5   :  { %v526_v61 = vpop.f32.mrf.mxu2  ;;  %v687_v62 = vpop.f32.mrf.mxu3 }
  0xb6   :  { %v527_v63 = vadd.f32 %v526_v61, %v1291_v38  ;;  %829 = vst [vmem:[#allocation2 + $0x20] sm:$0xff] %v366_v60  ;;  %412 = vmatmul.f32.gmra.mxu1 %v52_v55 }
  0xb8   :  { %v688_v2 = vadd.f32 %v687_v62, %v527_v63  ;;  %v65_v62 = vld [vmem:[%s1577_s0 + $0x190] sm:$0xff]  ;;  %v66_v63 = vld [vmem:[%s1577_s0 + $0x198] sm:$0xff] }
  0xb9   :  { %v207_v3 = vpop.f32.mrf.mxu0 }
  0xba   :  { %830 = vst [vmem:[#allocation2 + $0x28] sm:$0xff] %v688_v2  ;;  %576 = vmatmul.f32.gmra.mxu2 %v53_v0  ;;  %737 = vmatmul.f32.gmra.mxu3 %v54_v1  ;;  %v208_v4 = vadd.f32 %v207_v3, %v1282_v33 }
  0xbb   :  { %v368_v5 = vpop.f32.mrf.mxu1 }
  0xbc   :  { %v369_v6 = vadd.f32 %v368_v5, %v208_v4  ;;  %254 = vmatmul.f32.gmra.mxu0 %v53_v0 }
  0xbd   :  { %v529_v7 = vpop.f32.mrf.mxu2  ;;  %v690_v8 = vpop.f32.mrf.mxu3 }
  0xbe   :  { %v530_v9 = vadd.f32 %v529_v7, %v1291_v38  ;;  %831 = vst [vmem:[#allocation2 + $0x30] sm:$0xff] %v369_v6  ;;  %415 = vmatmul.f32.gmra.mxu1 %v54_v1 }
  0xc0   :  { %v691_v12 = vadd.f32 %v690_v8, %v530_v9  ;;  %v67_v8 = vld [vmem:[%s1577_s0 + $0x1a0] sm:$0xff]  ;;  %v68_v9 = vld [vmem:[%s1577_s0 + $0x1a8] sm:$0xff] }
  0xc1   :  { %v210_v13 = vpop.f32.mrf.mxu0 }
  0xc2   :  { %832 = vst [vmem:[#allocation2 + $0x38] sm:$0xff] %v691_v12  ;;  %579 = vmatmul.f32.gmra.mxu2 %v55_v10  ;;  %740 = vmatmul.f32.gmra.mxu3 %v56_v11  ;;  %v211_v14 = vadd.f32 %v210_v13, %v1282_v33 }
  0xc3   :  { %v371_v15 = vpop.f32.mrf.mxu1 }
  0xc4   :  { %v372_v16 = vadd.f32 %v371_v15, %v211_v14  ;;  %257 = vmatmul.f32.gmra.mxu0 %v55_v10 }
  0xc5   :  { %v532_v17 = vpop.f32.mrf.mxu2  ;;  %v693_v18 = vpop.f32.mrf.mxu3 }
  0xc6   :  { %v533_v19 = vadd.f32 %v532_v17, %v1291_v38  ;;  %833 = vst [vmem:[#allocation2 + $0x40] sm:$0xff] %v372_v16  ;;  %418 = vmatmul.f32.gmra.mxu1 %v56_v11 }
  0xc8   :  { %v694_v22 = vadd.f32 %v693_v18, %v533_v19  ;;  %v69_v18 = vld [vmem:[%s1577_s0 + $0x1b0] sm:$0xff]  ;;  %v70_v19 = vld [vmem:[%s1577_s0 + $0x1b8] sm:$0xff] }
  0xc9   :  { %v213_v23 = vpop.f32.mrf.mxu0 }
  0xca   :  { %834 = vst [vmem:[#allocation2 + $0x48] sm:$0xff] %v694_v22  ;;  %582 = vmatmul.f32.gmra.mxu2 %v57_v20  ;;  %743 = vmatmul.f32.gmra.mxu3 %v58_v21  ;;  %v214_v24 = vadd.f32 %v213_v23, %v1282_v33 }
  0xcb   :  { %v374_v25 = vpop.f32.mrf.mxu1 }
  0xcc   :  { %v375_v26 = vadd.f32 %v374_v25, %v214_v24  ;;  %260 = vmatmul.f32.gmra.mxu0 %v57_v20 }
  0xcd   :  { %v535_v27 = vpop.f32.mrf.mxu2  ;;  %v696_v28 = vpop.f32.mrf.mxu3 }
  0xce   :  { %v536_v29 = vadd.f32 %v535_v27, %v1291_v38  ;;  %835 = vst [vmem:[#allocation2 + $0x50] sm:$0xff] %v375_v26  ;;  %421 = vmatmul.f32.gmra.mxu1 %v58_v21 }
  0xd0   :  { %v697_v32 = vadd.f32 %v696_v28, %v536_v29  ;;  %v71_v28 = vld [vmem:[%s1577_s0 + $0x1c0] sm:$0xff]  ;;  %v72_v29 = vld [vmem:[%s1577_s0 + $0x1c8] sm:$0xff] }
  0xd1   :  { %v216_v34 = vpop.f32.mrf.mxu0 }
  0xd2   :  { %836 = vst [vmem:[#allocation2 + $0x58] sm:$0xff] %v697_v32  ;;  %585 = vmatmul.f32.gmra.mxu2 %v59_v30  ;;  %746 = vmatmul.f32.gmra.mxu3 %v60_v31  ;;  %v217_v35 = vadd.f32 %v216_v34, %v1282_v33 }
  0xd3   :  { %v377_v36 = vpop.f32.mrf.mxu1 }
  0xd4   :  { %v378_v37 = vadd.f32 %v377_v36, %v217_v35  ;;  %263 = vmatmul.f32.gmra.mxu0 %v59_v30 }
  0xd5   :  { %v538_v39 = vpop.f32.mrf.mxu2  ;;  %v699_v40 = vpop.f32.mrf.mxu3 }
  0xd6   :  { %v539_v41 = vadd.f32 %v538_v39, %v1291_v38  ;;  %837 = vst [vmem:[#allocation2 + $0x60] sm:$0xff] %v378_v37  ;;  %424 = vmatmul.f32.gmra.mxu1 %v60_v31 }
  0xd8   :  { %v700_v44 = vadd.f32 %v699_v40, %v539_v41  ;;  %v73_v40 = vld [vmem:[%s1577_s0 + $0x1d0] sm:$0xff]  ;;  %v74_v41 = vld [vmem:[%s1577_s0 + $0x1d8] sm:$0xff] }
  0xd9   :  { %v219_v45 = vpop.f32.mrf.mxu0 }
  0xda   :  { %838 = vst [vmem:[#allocation2 + $0x68] sm:$0xff] %v700_v44  ;;  %588 = vmatmul.f32.gmra.mxu2 %v61_v42  ;;  %749 = vmatmul.f32.gmra.mxu3 %v62_v43  ;;  %v220_v46 = vadd.f32 %v219_v45, %v1282_v33 }
  0xdb   :  { %v380_v47 = vpop.f32.mrf.mxu1 }
  0xdc   :  { %v381_v48 = vadd.f32 %v380_v47, %v220_v46  ;;  %266 = vmatmul.f32.gmra.mxu0 %v61_v42 }
  0xdd   :  { %v541_v49 = vpop.f32.mrf.mxu2  ;;  %v702_v50 = vpop.f32.mrf.mxu3 }
  0xde   :  { %v542_v51 = vadd.f32 %v541_v49, %v1291_v38  ;;  %839 = vst [vmem:[#allocation2 + $0x70] sm:$0xff] %v381_v48  ;;  %427 = vmatmul.f32.gmra.mxu1 %v62_v43 }
  0xe0   :  { %v703_v54 = vadd.f32 %v702_v50, %v542_v51  ;;  %v75_v50 = vld [vmem:[%s1577_s0 + $0x1e0] sm:$0xff]  ;;  %v76_v51 = vld [vmem:[%s1577_s0 + $0x1e8] sm:$0xff] }
  0xe1   :  { %v222_v55 = vpop.f32.mrf.mxu0 }
  0xe2   :  { %840 = vst [vmem:[#allocation2 + $0x78] sm:$0xff] %v703_v54  ;;  %591 = vmatmul.f32.gmra.mxu2 %v63_v52  ;;  %752 = vmatmul.f32.gmra.mxu3 %v64_v53  ;;  %v223_v56 = vadd.f32 %v222_v55, %v1282_v33 }
  0xe3   :  { %v383_v57 = vpop.f32.mrf.mxu1 }
  0xe4   :  { %v384_v58 = vadd.f32 %v383_v57, %v223_v56  ;;  %269 = vmatmul.f32.gmra.mxu0 %v63_v52 }
  0xe5   :  { %v544_v59 = vpop.f32.mrf.mxu2  ;;  %v705_v60 = vpop.f32.mrf.mxu3 }
  0xe6   :  { %v545_v61 = vadd.f32 %v544_v59, %v1291_v38  ;;  %841 = vst [vmem:[#allocation2 + $0x80] sm:$0xff] %v384_v58  ;;  %430 = vmatmul.f32.gmra.mxu1 %v64_v53 }
  0xe8   :  { %v706_v0 = vadd.f32 %v705_v60, %v545_v61  ;;  %v77_v60 = vld [vmem:[%s1577_s0 + $0x1f0] sm:$0xff]  ;;  %v78_v61 = vld [vmem:[%s1577_s0 + $0x1f8] sm:$0xff] }
  0xe9   :  { %v225_v1 = vpop.f32.mrf.mxu0 }
  0xea   :  { %842 = vst [vmem:[#allocation2 + $0x88] sm:$0xff] %v706_v0  ;;  %594 = vmatmul.f32.gmra.mxu2 %v65_v62  ;;  %755 = vmatmul.f32.gmra.mxu3 %v66_v63  ;;  %v226_v2 = vadd.f32 %v225_v1, %v1282_v33 }
  0xeb   :  { %v386_v3 = vpop.f32.mrf.mxu1 }
  0xec   :  { %v387_v4 = vadd.f32 %v386_v3, %v226_v2  ;;  %272 = vmatmul.f32.gmra.mxu0 %v65_v62 }
  0xed   :  { %v547_v5 = vpop.f32.mrf.mxu2  ;;  %v708_v6 = vpop.f32.mrf.mxu3 }
  0xee   :  { %v548_v7 = vadd.f32 %v547_v5, %v1291_v38  ;;  %843 = vst [vmem:[#allocation2 + $0x90] sm:$0xff] %v387_v4  ;;  %433 = vmatmul.f32.gmra.mxu1 %v66_v63 }
  0xf0   :  { %v709_v10 = vadd.f32 %v708_v6, %v548_v7  ;;  %v79_v6 = vld [vmem:[%s1577_s0 + $0x200] sm:$0xff]  ;;  %v80_v7 = vld [vmem:[%s1577_s0 + $0x208] sm:$0xff] }
  0xf1   :  { %v228_v11 = vpop.f32.mrf.mxu0 }
  0xf2   :  { %844 = vst [vmem:[#allocation2 + $0x98] sm:$0xff] %v709_v10  ;;  %597 = vmatmul.f32.gmra.mxu2 %v67_v8  ;;  %758 = vmatmul.f32.gmra.mxu3 %v68_v9  ;;  %v229_v12 = vadd.f32 %v228_v11, %v1282_v33 }
  0xf3   :  { %v389_v13 = vpop.f32.mrf.mxu1 }
  0xf4   :  { %v390_v14 = vadd.f32 %v389_v13, %v229_v12  ;;  %275 = vmatmul.f32.gmra.mxu0 %v67_v8 }
  0xf5   :  { %v550_v15 = vpop.f32.mrf.mxu2  ;;  %v711_v16 = vpop.f32.mrf.mxu3 }
  0xf6   :  { %v551_v17 = vadd.f32 %v550_v15, %v1291_v38  ;;  %845 = vst [vmem:[#allocation2 + $0xa0] sm:$0xff] %v390_v14  ;;  %436 = vmatmul.f32.gmra.mxu1 %v68_v9 }
  0xf8   :  { %v712_v20 = vadd.f32 %v711_v16, %v551_v17  ;;  %v81_v16 = vld [vmem:[%s1577_s0 + $0x210] sm:$0xff]  ;;  %v82_v17 = vld [vmem:[%s1577_s0 + $0x218] sm:$0xff] }
  0xf9   :  { %v231_v21 = vpop.f32.mrf.mxu0 }
  0xfa   :  { %846 = vst [vmem:[#allocation2 + $0xa8] sm:$0xff] %v712_v20  ;;  %600 = vmatmul.f32.gmra.mxu2 %v69_v18  ;;  %761 = vmatmul.f32.gmra.mxu3 %v70_v19  ;;  %v232_v22 = vadd.f32 %v231_v21, %v1282_v33 }
  0xfb   :  { %v392_v23 = vpop.f32.mrf.mxu1 }
  0xfc   :  { %v393_v24 = vadd.f32 %v392_v23, %v232_v22  ;;  %278 = vmatmul.f32.gmra.mxu0 %v69_v18 }
  0xfd   :  { %v553_v25 = vpop.f32.mrf.mxu2  ;;  %v714_v26 = vpop.f32.mrf.mxu3 }
  0xfe   :  { %v554_v27 = vadd.f32 %v553_v25, %v1291_v38  ;;  %847 = vst [vmem:[#allocation2 + $0xb0] sm:$0xff] %v393_v24  ;;  %439 = vmatmul.f32.gmra.mxu1 %v70_v19 }
 0x100   :  { %v715_v30 = vadd.f32 %v714_v26, %v554_v27  ;;  %v83_v26 = vld [vmem:[%s1577_s0 + $0x220] sm:$0xff]  ;;  %v84_v27 = vld [vmem:[%s1577_s0 + $0x228] sm:$0xff] }
 0x101   :  { %v234_v31 = vpop.f32.mrf.mxu0 }
 0x102   :  { %848 = vst [vmem:[#allocation2 + $0xb8] sm:$0xff] %v715_v30  ;;  %603 = vmatmul.f32.gmra.mxu2 %v71_v28  ;;  %764 = vmatmul.f32.gmra.mxu3 %v72_v29  ;;  %v235_v32 = vadd.f32 %v234_v31, %v1282_v33 }
 0x103   :  { %v395_v34 = vpop.f32.mrf.mxu1 }
 0x104   :  { %v396_v35 = vadd.f32 %v395_v34, %v235_v32  ;;  %281 = vmatmul.f32.gmra.mxu0 %v71_v28 }
 0x105   :  { %v556_v36 = vpop.f32.mrf.mxu2  ;;  %v717_v37 = vpop.f32.mrf.mxu3 }
 0x106   :  { %v557_v39 = vadd.f32 %v556_v36, %v1291_v38  ;;  %849 = vst [vmem:[#allocation2 + $0xc0] sm:$0xff] %v396_v35  ;;  %442 = vmatmul.f32.gmra.mxu1 %v72_v29 }
 0x108   :  { %v718_v42 = vadd.f32 %v717_v37, %v557_v39  ;;  %v85_v37 = vld [vmem:[%s1577_s0 + $0x230] sm:$0xff]  ;;  %v86_v39 = vld [vmem:[%s1577_s0 + $0x238] sm:$0xff] }
 0x109   :  { %v237_v43 = vpop.f32.mrf.mxu0 }
 0x10a   :  { %850 = vst [vmem:[#allocation2 + $0xc8] sm:$0xff] %v718_v42  ;;  %606 = vmatmul.f32.gmra.mxu2 %v73_v40  ;;  %767 = vmatmul.f32.gmra.mxu3 %v74_v41  ;;  %v238_v44 = vadd.f32 %v237_v43, %v1282_v33 }
 0x10b   :  { %v398_v45 = vpop.f32.mrf.mxu1 }
 0x10c   :  { %v399_v46 = vadd.f32 %v398_v45, %v238_v44  ;;  %284 = vmatmul.f32.gmra.mxu0 %v73_v40 }
 0x10d   :  { %v559_v47 = vpop.f32.mrf.mxu2  ;;  %v720_v48 = vpop.f32.mrf.mxu3 }
 0x10e   :  { %v560_v49 = vadd.f32 %v559_v47, %v1291_v38  ;;  %851 = vst [vmem:[#allocation2 + $0xd0] sm:$0xff] %v399_v46  ;;  %445 = vmatmul.f32.gmra.mxu1 %v74_v41 }
 0x110   :  { %v721_v52 = vadd.f32 %v720_v48, %v560_v49  ;;  %v87_v48 = vld [vmem:[%s1577_s0 + $0x240] sm:$0xff]  ;;  %v88_v49 = vld [vmem:[%s1577_s0 + $0x248] sm:$0xff] }
 0x111   :  { %v240_v53 = vpop.f32.mrf.mxu0 }
 0x112   :  { %852 = vst [vmem:[#allocation2 + $0xd8] sm:$0xff] %v721_v52  ;;  %609 = vmatmul.f32.gmra.mxu2 %v75_v50  ;;  %770 = vmatmul.f32.gmra.mxu3 %v76_v51  ;;  %v241_v54 = vadd.f32 %v240_v53, %v1282_v33 }
 0x113   :  { %v401_v55 = vpop.f32.mrf.mxu1 }
 0x114   :  { %v402_v56 = vadd.f32 %v401_v55, %v241_v54  ;;  %287 = vmatmul.f32.gmra.mxu0 %v75_v50 }
 0x115   :  { %v562_v57 = vpop.f32.mrf.mxu2  ;;  %v723_v58 = vpop.f32.mrf.mxu3 }
 0x116   :  { %v563_v59 = vadd.f32 %v562_v57, %v1291_v38  ;;  %853 = vst [vmem:[#allocation2 + $0xe0] sm:$0xff] %v402_v56  ;;  %448 = vmatmul.f32.gmra.mxu1 %v76_v51 }
 0x118   :  { %v724_v62 = vadd.f32 %v723_v58, %v563_v59  ;;  %v89_v58 = vld [vmem:[%s1577_s0 + $0x250] sm:$0xff]  ;;  %v90_v59 = vld [vmem:[%s1577_s0 + $0x258] sm:$0xff] }
 0x119   :  { %v243_v63 = vpop.f32.mrf.mxu0 }
 0x11a   :  { %854 = vst [vmem:[#allocation2 + $0xe8] sm:$0xff] %v724_v62  ;;  %612 = vmatmul.f32.gmra.mxu2 %v77_v60  ;;  %773 = vmatmul.f32.gmra.mxu3 %v78_v61  ;;  %v244_v0 = vadd.f32 %v243_v63, %v1282_v33 }
 0x11b   :  { %v404_v1 = vpop.f32.mrf.mxu1 }
 0x11c   :  { %v405_v2 = vadd.f32 %v404_v1, %v244_v0  ;;  %290 = vmatmul.f32.gmra.mxu0 %v77_v60 }
 0x11d   :  { %v565_v3 = vpop.f32.mrf.mxu2  ;;  %v726_v4 = vpop.f32.mrf.mxu3 }
 0x11e   :  { %v566_v5 = vadd.f32 %v565_v3, %v1291_v38  ;;  %855 = vst [vmem:[#allocation2 + $0xf0] sm:$0xff] %v405_v2  ;;  %451 = vmatmul.f32.gmra.mxu1 %v78_v61 }
 0x120   :  { %v727_v8 = vadd.f32 %v726_v4, %v566_v5  ;;  %v91_v4 = vld [vmem:[%s1577_s0 + $0x260] sm:$0xff]  ;;  %v92_v5 = vld [vmem:[%s1577_s0 + $0x268] sm:$0xff] }
 0x121   :  { %v246_v9 = vpop.f32.mrf.mxu0 }
 0x122   :  { %856 = vst [vmem:[#allocation2 + $0xf8] sm:$0xff] %v727_v8  ;;  %615 = vmatmul.f32.gmra.mxu2 %v79_v6  ;;  %776 = vmatmul.f32.gmra.mxu3 %v80_v7  ;;  %v247_v10 = vadd.f32 %v246_v9, %v1282_v33 }
 0x123   :  { %v407_v11 = vpop.f32.mrf.mxu1 }
 0x124   :  { %v408_v12 = vadd.f32 %v407_v11, %v247_v10  ;;  %293 = vmatmul.f32.gmra.mxu0 %v79_v6 }
 0x125   :  { %v568_v13 = vpop.f32.mrf.mxu2  ;;  %v729_v14 = vpop.f32.mrf.mxu3 }
 0x126   :  { %v569_v15 = vadd.f32 %v568_v13, %v1291_v38  ;;  %857 = vst [vmem:[#allocation2 + $0x100] sm:$0xff] %v408_v12  ;;  %454 = vmatmul.f32.gmra.mxu1 %v80_v7 }
 0x128   :  { %v730_v18 = vadd.f32 %v729_v14, %v569_v15  ;;  %v93_v14 = vld [vmem:[%s1577_s0 + $0x270] sm:$0xff]  ;;  %v94_v15 = vld [vmem:[%s1577_s0 + $0x278] sm:$0xff] }
 0x129   :  { %v249_v19 = vpop.f32.mrf.mxu0 }
 0x12a   :  { %858 = vst [vmem:[#allocation2 + $0x108] sm:$0xff] %v730_v18  ;;  %618 = vmatmul.f32.gmra.mxu2 %v81_v16  ;;  %779 = vmatmul.f32.gmra.mxu3 %v82_v17  ;;  %v250_v20 = vadd.f32 %v249_v19, %v1282_v33 }
 0x12b   :  { %v410_v21 = vpop.f32.mrf.mxu1 }
 0x12c   :  { %v411_v22 = vadd.f32 %v410_v21, %v250_v20  ;;  %296 = vmatmul.f32.gmra.mxu0 %v81_v16 }
 0x12d   :  { %v571_v23 = vpop.f32.mrf.mxu2  ;;  %v732_v24 = vpop.f32.mrf.mxu3 }
 0x12e   :  { %v572_v25 = vadd.f32 %v571_v23, %v1291_v38  ;;  %859 = vst [vmem:[#allocation2 + $0x110] sm:$0xff] %v411_v22  ;;  %457 = vmatmul.f32.gmra.mxu1 %v82_v17 }
 0x130   :  { %v733_v28 = vadd.f32 %v732_v24, %v572_v25  ;;  %v95_v24 = vld [vmem:[%s1577_s0 + $0x280] sm:$0xff]  ;;  %v96_v25 = vld [vmem:[%s1577_s0 + $0x288] sm:$0xff] }
 0x131   :  { %v252_v29 = vpop.f32.mrf.mxu0 }
 0x132   :  { %860 = vst [vmem:[#allocation2 + $0x118] sm:$0xff] %v733_v28  ;;  %621 = vmatmul.f32.gmra.mxu2 %v83_v26  ;;  %782 = vmatmul.f32.gmra.mxu3 %v84_v27  ;;  %v253_v30 = vadd.f32 %v252_v29, %v1282_v33 }
 0x133   :  { %v413_v31 = vpop.f32.mrf.mxu1 }
 0x134   :  { %v414_v32 = vadd.f32 %v413_v31, %v253_v30  ;;  %299 = vmatmul.f32.gmra.mxu0 %v83_v26 }
 0x135   :  { %v574_v34 = vpop.f32.mrf.mxu2  ;;  %v735_v35 = vpop.f32.mrf.mxu3 }
 0x136   :  { %v575_v36 = vadd.f32 %v574_v34, %v1291_v38  ;;  %861 = vst [vmem:[#allocation2 + $0x120] sm:$0xff] %v414_v32  ;;  %460 = vmatmul.f32.gmra.mxu1 %v84_v27 }
 0x138   :  { %v736_v40 = vadd.f32 %v735_v35, %v575_v36  ;;  %v97_v35 = vld [vmem:[%s1577_s0 + $0x290] sm:$0xff]  ;;  %v98_v36 = vld [vmem:[%s1577_s0 + $0x298] sm:$0xff] }
 0x139   :  { %v255_v41 = vpop.f32.mrf.mxu0 }
 0x13a   :  { %862 = vst [vmem:[#allocation2 + $0x128] sm:$0xff] %v736_v40  ;;  %624 = vmatmul.f32.gmra.mxu2 %v85_v37  ;;  %785 = vmatmul.f32.gmra.mxu3 %v86_v39  ;;  %v256_v42 = vadd.f32 %v255_v41, %v1282_v33 }
 0x13b   :  { %v416_v43 = vpop.f32.mrf.mxu1 }
 0x13c   :  { %v417_v44 = vadd.f32 %v416_v43, %v256_v42  ;;  %302 = vmatmul.f32.gmra.mxu0 %v85_v37 }
 0x13d   :  { %v577_v45 = vpop.f32.mrf.mxu2  ;;  %v738_v46 = vpop.f32.mrf.mxu3 }
 0x13e   :  { %v578_v47 = vadd.f32 %v577_v45, %v1291_v38  ;;  %863 = vst [vmem:[#allocation2 + $0x130] sm:$0xff] %v417_v44  ;;  %463 = vmatmul.f32.gmra.mxu1 %v86_v39 }
 0x140   :  { %v739_v50 = vadd.f32 %v738_v46, %v578_v47  ;;  %v99_v46 = vld [vmem:[%s1577_s0 + $0x2a0] sm:$0xff]  ;;  %v100_v47 = vld [vmem:[%s1577_s0 + $0x2a8] sm:$0xff] }
 0x141   :  { %v258_v51 = vpop.f32.mrf.mxu0 }
 0x142   :  { %864 = vst [vmem:[#allocation2 + $0x138] sm:$0xff] %v739_v50  ;;  %627 = vmatmul.f32.gmra.mxu2 %v87_v48  ;;  %788 = vmatmul.f32.gmra.mxu3 %v88_v49  ;;  %v259_v52 = vadd.f32 %v258_v51, %v1282_v33 }
 0x143   :  { %v419_v53 = vpop.f32.mrf.mxu1 }
 0x144   :  { %v420_v54 = vadd.f32 %v419_v53, %v259_v52  ;;  %305 = vmatmul.f32.gmra.mxu0 %v87_v48 }
 0x145   :  { %v580_v55 = vpop.f32.mrf.mxu2  ;;  %v741_v56 = vpop.f32.mrf.mxu3 }
 0x146   :  { %v581_v57 = vadd.f32 %v580_v55, %v1291_v38  ;;  %865 = vst [vmem:[#allocation2 + $0x140] sm:$0xff] %v420_v54  ;;  %466 = vmatmul.f32.gmra.mxu1 %v88_v49 }
 0x148   :  { %v742_v60 = vadd.f32 %v741_v56, %v581_v57  ;;  %v101_v56 = vld [vmem:[%s1577_s0 + $0x2b0] sm:$0xff]  ;;  %v102_v57 = vld [vmem:[%s1577_s0 + $0x2b8] sm:$0xff] }
 0x149   :  { %v261_v61 = vpop.f32.mrf.mxu0 }
 0x14a   :  { %866 = vst [vmem:[#allocation2 + $0x148] sm:$0xff] %v742_v60  ;;  %630 = vmatmul.f32.gmra.mxu2 %v89_v58  ;;  %791 = vmatmul.f32.gmra.mxu3 %v90_v59  ;;  %v262_v62 = vadd.f32 %v261_v61, %v1282_v33 }
 0x14b   :  { %v422_v63 = vpop.f32.mrf.mxu1 }
 0x14c   :  { %v423_v0 = vadd.f32 %v422_v63, %v262_v62  ;;  %308 = vmatmul.f32.gmra.mxu0 %v89_v58 }
 0x14d   :  { %v583_v1 = vpop.f32.mrf.mxu2  ;;  %v744_v2 = vpop.f32.mrf.mxu3 }
 0x14e   :  { %v584_v3 = vadd.f32 %v583_v1, %v1291_v38  ;;  %867 = vst [vmem:[#allocation2 + $0x150] sm:$0xff] %v423_v0  ;;  %469 = vmatmul.f32.gmra.mxu1 %v90_v59 }
 0x150   :  { %v745_v6 = vadd.f32 %v744_v2, %v584_v3  ;;  %v103_v2 = vld [vmem:[%s1577_s0 + $0x2c0] sm:$0xff]  ;;  %v104_v3 = vld [vmem:[%s1577_s0 + $0x2c8] sm:$0xff] }
 0x151   :  { %v264_v7 = vpop.f32.mrf.mxu0 }
 0x152   :  { %868 = vst [vmem:[#allocation2 + $0x158] sm:$0xff] %v745_v6  ;;  %633 = vmatmul.f32.gmra.mxu2 %v91_v4  ;;  %794 = vmatmul.f32.gmra.mxu3 %v92_v5  ;;  %v265_v8 = vadd.f32 %v264_v7, %v1282_v33 }
 0x153   :  { %v425_v9 = vpop.f32.mrf.mxu1 }
 0x154   :  { %v426_v10 = vadd.f32 %v425_v9, %v265_v8  ;;  %311 = vmatmul.f32.gmra.mxu0 %v91_v4 }
 0x155   :  { %v586_v11 = vpop.f32.mrf.mxu2  ;;  %v747_v12 = vpop.f32.mrf.mxu3 }
 0x156   :  { %v587_v13 = vadd.f32 %v586_v11, %v1291_v38  ;;  %869 = vst [vmem:[#allocation2 + $0x160] sm:$0xff] %v426_v10  ;;  %472 = vmatmul.f32.gmra.mxu1 %v92_v5 }
 0x158   :  { %v748_v16 = vadd.f32 %v747_v12, %v587_v13  ;;  %v105_v12 = vld [vmem:[%s1577_s0 + $0x2d0] sm:$0xff]  ;;  %v106_v13 = vld [vmem:[%s1577_s0 + $0x2d8] sm:$0xff] }
 0x159   :  { %v267_v17 = vpop.f32.mrf.mxu0 }
 0x15a   :  { %870 = vst [vmem:[#allocation2 + $0x168] sm:$0xff] %v748_v16  ;;  %636 = vmatmul.f32.gmra.mxu2 %v93_v14  ;;  %797 = vmatmul.f32.gmra.mxu3 %v94_v15  ;;  %v268_v18 = vadd.f32 %v267_v17, %v1282_v33 }
 0x15b   :  { %v428_v19 = vpop.f32.mrf.mxu1 }
 0x15c   :  { %v429_v20 = vadd.f32 %v428_v19, %v268_v18  ;;  %314 = vmatmul.f32.gmra.mxu0 %v93_v14 }
 0x15d   :  { %v589_v21 = vpop.f32.mrf.mxu2  ;;  %v750_v22 = vpop.f32.mrf.mxu3 }
 0x15e   :  { %v590_v23 = vadd.f32 %v589_v21, %v1291_v38  ;;  %871 = vst [vmem:[#allocation2 + $0x170] sm:$0xff] %v429_v20  ;;  %475 = vmatmul.f32.gmra.mxu1 %v94_v15 }
 0x160   :  { %v751_v26 = vadd.f32 %v750_v22, %v590_v23  ;;  %v107_v22 = vld [vmem:[%s1577_s0 + $0x2e0] sm:$0xff]  ;;  %v108_v23 = vld [vmem:[%s1577_s0 + $0x2e8] sm:$0xff] }
 0x161   :  { %v270_v27 = vpop.f32.mrf.mxu0 }
 0x162   :  { %872 = vst [vmem:[#allocation2 + $0x178] sm:$0xff] %v751_v26  ;;  %639 = vmatmul.f32.gmra.mxu2 %v95_v24  ;;  %800 = vmatmul.f32.gmra.mxu3 %v96_v25  ;;  %v271_v28 = vadd.f32 %v270_v27, %v1282_v33 }
 0x163   :  { %v431_v29 = vpop.f32.mrf.mxu1 }
 0x164   :  { %v432_v30 = vadd.f32 %v431_v29, %v271_v28  ;;  %317 = vmatmul.f32.gmra.mxu0 %v95_v24 }
 0x165   :  { %v592_v31 = vpop.f32.mrf.mxu2  ;;  %v753_v32 = vpop.f32.mrf.mxu3 }
 0x166   :  { %v593_v34 = vadd.f32 %v592_v31, %v1291_v38  ;;  %873 = vst [vmem:[#allocation2 + $0x180] sm:$0xff] %v432_v30  ;;  %478 = vmatmul.f32.gmra.mxu1 %v96_v25 }
 0x168   :  { %v754_v37 = vadd.f32 %v753_v32, %v593_v34  ;;  %v109_v32 = vld [vmem:[%s1577_s0 + $0x2f0] sm:$0xff]  ;;  %v110_v34 = vld [vmem:[%s1577_s0 + $0x2f8] sm:$0xff]  ;;  %s968_s0 = smov [#allocation2]  }
 0x169   :  { %v273_v39 = vpop.f32.mrf.mxu0  ;;  %s925_s25 = sshll.u32 %s968_s0, 4  ;;  %s926_s25 = int_to_ptr.vmem [resolvable:$true] %s925_s25 }
 0x16a   :  { %874 = vst [vmem:[#allocation2 + $0x188] sm:$0xff] %v754_v37  ;;  %642 = vmatmul.f32.gmra.mxu2 %v97_v35  ;;  %803 = vmatmul.f32.gmra.mxu3 %v98_v36  ;;  %v274_v40 = vadd.f32 %v273_v39, %v1282_v33 }
 0x16b   :  { %v434_v41 = vpop.f32.mrf.mxu1 }
 0x16c   :  { %v435_v42 = vadd.f32 %v434_v41, %v274_v40  ;;  %320 = vmatmul.f32.gmra.mxu0 %v97_v35 }
 0x16d   :  { %v595_v43 = vpop.f32.mrf.mxu2  ;;  %v756_v44 = vpop.f32.mrf.mxu3 }
 0x16e   :  { %v596_v45 = vadd.f32 %v595_v43, %v1291_v38  ;;  %875 = vst [vmem:[#allocation2 + $0x190] sm:$0xff] %v435_v42  ;;  %481 = vmatmul.f32.gmra.mxu1 %v98_v36 }
 0x170   :  { %v757_v48 = vadd.f32 %v756_v44, %v596_v45 }
 0x171   :  { %v276_v49 = vpop.f32.mrf.mxu0 }
 0x172   :  { %876 = vst [vmem:[#allocation2 + $0x198] sm:$0xff] %v757_v48  ;;  %645 = vmatmul.f32.gmra.mxu2 %v99_v46  ;;  %806 = vmatmul.f32.gmra.mxu3 %v100_v47  ;;  %v277_v50 = vadd.f32 %v276_v49, %v1282_v33 }
 0x173   :  { %v437_v51 = vpop.f32.mrf.mxu1 }
 0x174   :  { %v438_v52 = vadd.f32 %v437_v51, %v277_v50  ;;  %323 = vmatmul.f32.gmra.mxu0 %v99_v46 }
 0x175   :  { %v598_v53 = vpop.f32.mrf.mxu2  ;;  %v759_v54 = vpop.f32.mrf.mxu3 }
 0x176   :  { %v599_v55 = vadd.f32 %v598_v53, %v1291_v38  ;;  %877 = vst [vmem:[#allocation2 + $0x1a0] sm:$0xff] %v438_v52  ;;  %484 = vmatmul.f32.gmra.mxu1 %v100_v47 }
 0x178   :  { %v760_v58 = vadd.f32 %v759_v54, %v599_v55 }
 0x179   :  { %v279_v59 = vpop.f32.mrf.mxu0 }
 0x17a   :  { %878 = vst [vmem:[#allocation2 + $0x1a8] sm:$0xff] %v760_v58  ;;  %648 = vmatmul.f32.gmra.mxu2 %v101_v56  ;;  %809 = vmatmul.f32.gmra.mxu3 %v102_v57  ;;  %v280_v60 = vadd.f32 %v279_v59, %v1282_v33 }
 0x17b   :  { %v440_v61 = vpop.f32.mrf.mxu1 }
 0x17c   :  { %v441_v62 = vadd.f32 %v440_v61, %v280_v60  ;;  %326 = vmatmul.f32.gmra.mxu0 %v101_v56 }
 0x17d   :  { %v601_v63 = vpop.f32.mrf.mxu2  ;;  %v762_v0 = vpop.f32.mrf.mxu3 }
 0x17e   :  { %v602_v1 = vadd.f32 %v601_v63, %v1291_v38  ;;  %879 = vst [vmem:[#allocation2 + $0x1b0] sm:$0xff] %v441_v62  ;;  %487 = vmatmul.f32.gmra.mxu1 %v102_v57 }
 0x180   :  { %v763_v4 = vadd.f32 %v762_v0, %v602_v1 }
 0x181   :  { %v282_v5 = vpop.f32.mrf.mxu0 }
 0x182   :  { %880 = vst [vmem:[#allocation2 + $0x1b8] sm:$0xff] %v763_v4  ;;  %651 = vmatmul.f32.gmra.mxu2 %v103_v2  ;;  %812 = vmatmul.f32.gmra.mxu3 %v104_v3  ;;  %v283_v6 = vadd.f32 %v282_v5, %v1282_v33 }
 0x183   :  { %v443_v7 = vpop.f32.mrf.mxu1 }
 0x184   :  { %v444_v8 = vadd.f32 %v443_v7, %v283_v6  ;;  %329 = vmatmul.f32.gmra.mxu0 %v103_v2 }
 0x185   :  { %v604_v9 = vpop.f32.mrf.mxu2  ;;  %v765_v10 = vpop.f32.mrf.mxu3 }
 0x186   :  { %v605_v11 = vadd.f32 %v604_v9, %v1291_v38  ;;  %881 = vst [vmem:[#allocation2 + $0x1c0] sm:$0xff] %v444_v8  ;;  %490 = vmatmul.f32.gmra.mxu1 %v104_v3 }
 0x188   :  { %v766_v14 = vadd.f32 %v765_v10, %v605_v11 }
 0x189   :  { %v285_v15 = vpop.f32.mrf.mxu0 }
 0x18a   :  { %882 = vst [vmem:[#allocation2 + $0x1c8] sm:$0xff] %v766_v14  ;;  %654 = vmatmul.f32.gmra.mxu2 %v105_v12  ;;  %815 = vmatmul.f32.gmra.mxu3 %v106_v13  ;;  %v286_v16 = vadd.f32 %v285_v15, %v1282_v33 }
 0x18b   :  { %v446_v17 = vpop.f32.mrf.mxu1 }
 0x18c   :  { %v447_v18 = vadd.f32 %v446_v17, %v286_v16  ;;  %332 = vmatmul.f32.gmra.mxu0 %v105_v12 }
 0x18d   :  { %v607_v19 = vpop.f32.mrf.mxu2  ;;  %v768_v20 = vpop.f32.mrf.mxu3 }
 0x18e   :  { %v608_v21 = vadd.f32 %v607_v19, %v1291_v38  ;;  %883 = vst [vmem:[#allocation2 + $0x1d0] sm:$0xff] %v447_v18  ;;  %493 = vmatmul.f32.gmra.mxu1 %v106_v13 }
 0x190   :  { %v769_v24 = vadd.f32 %v768_v20, %v608_v21 }
 0x191   :  { %v288_v25 = vpop.f32.mrf.mxu0 }
 0x192   :  { %884 = vst [vmem:[#allocation2 + $0x1d8] sm:$0xff] %v769_v24  ;;  %657 = vmatmul.f32.gmra.mxu2 %v107_v22  ;;  %818 = vmatmul.f32.gmra.mxu3 %v108_v23  ;;  %v289_v26 = vadd.f32 %v288_v25, %v1282_v33 }
 0x193   :  { %v449_v27 = vpop.f32.mrf.mxu1 }
 0x194   :  { %v450_v28 = vadd.f32 %v449_v27, %v289_v26  ;;  %335 = vmatmul.f32.gmra.mxu0 %v107_v22 }
 0x195   :  { %v610_v29 = vpop.f32.mrf.mxu2  ;;  %v771_v30 = vpop.f32.mrf.mxu3 }
 0x196   :  { %v611_v31 = vadd.f32 %v610_v29, %v1291_v38  ;;  %885 = vst [vmem:[#allocation2 + $0x1e0] sm:$0xff] %v450_v28  ;;  %496 = vmatmul.f32.gmra.mxu1 %v108_v23 }
 0x198   :  { %v772_v35 = vadd.f32 %v771_v30, %v611_v31 }
 0x199   :  { %v291_v36 = vpop.f32.mrf.mxu0 }
 0x19a   :  { %886 = vst [vmem:[#allocation2 + $0x1e8] sm:$0xff] %v772_v35  ;;  %660 = vmatmul.f32.gmra.mxu2 %v109_v32  ;;  %821 = vmatmul.f32.gmra.mxu3 %v110_v34  ;;  %v292_v37 = vadd.f32 %v291_v36, %v1282_v33 }
 0x19b   :  { %v452_v39 = vpop.f32.mrf.mxu1 }
 0x19c   :  { %v453_v40 = vadd.f32 %v452_v39, %v292_v37  ;;  %338 = vmatmul.f32.gmra.mxu0 %v109_v32 }
 0x19d   :  { %v613_v41 = vpop.f32.mrf.mxu2  ;;  %v774_v42 = vpop.f32.mrf.mxu3 }
 0x19e   :  { %v614_v43 = vadd.f32 %v613_v41, %v1291_v38  ;;  %887 = vst [vmem:[#allocation2 + $0x1f0] sm:$0xff] %v453_v40  ;;  %499 = vmatmul.f32.gmra.mxu1 %v110_v34 }
 0x1a0   :  { %v775_v44 = vadd.f32 %v774_v42, %v614_v43 }
 0x1a1   :  { %v294_v45 = vpop.f32.mrf.mxu0 }
 0x1a2   :  { %888 = vst [vmem:[#allocation2 + $0x1f8] sm:$0xff] %v775_v44  ;;  %v295_v46 = vadd.f32 %v294_v45, %v1282_v33 }
 0x1a3   :  { %v455_v47 = vpop.f32.mrf.mxu1 }
 0x1a4   :  { %v456_v48 = vadd.f32 %v455_v47, %v295_v46 }
 0x1a5   :  { %v616_v49 = vpop.f32.mrf.mxu2  ;;  %v777_v50 = vpop.f32.mrf.mxu3 }
 0x1a6   :  { %v617_v51 = vadd.f32 %v616_v49, %v1291_v38  ;;  %889 = vst [vmem:[#allocation2 + $0x200] sm:$0xff] %v456_v48 }
 0x1a8   :  { %v778_v52 = vadd.f32 %v777_v50, %v617_v51 }
 0x1a9   :  { %v297_v53 = vpop.f32.mrf.mxu0 }
 0x1aa   :  { %890 = vst [vmem:[#allocation2 + $0x208] sm:$0xff] %v778_v52  ;;  %v298_v54 = vadd.f32 %v297_v53, %v1282_v33 }
 0x1ab   :  { %v458_v55 = vpop.f32.mrf.mxu1 }
 0x1ac   :  { %v459_v56 = vadd.f32 %v458_v55, %v298_v54 }
 0x1ad   :  { %v619_v57 = vpop.f32.mrf.mxu2  ;;  %v780_v58 = vpop.f32.mrf.mxu3 }
 0x1ae   :  { %v620_v59 = vadd.f32 %v619_v57, %v1291_v38  ;;  %891 = vst [vmem:[#allocation2 + $0x210] sm:$0xff] %v459_v56 }
 0x1b0   :  { %v781_v60 = vadd.f32 %v780_v58, %v620_v59 }
 0x1b1   :  { %v300_v61 = vpop.f32.mrf.mxu0 }
 0x1b2   :  { %892 = vst [vmem:[#allocation2 + $0x218] sm:$0xff] %v781_v60  ;;  %v301_v62 = vadd.f32 %v300_v61, %v1282_v33 }
 0x1b3   :  { %v461_v63 = vpop.f32.mrf.mxu1 }
 0x1b4   :  { %v462_v0 = vadd.f32 %v461_v63, %v301_v62 }
 0x1b5   :  { %v622_v1 = vpop.f32.mrf.mxu2  ;;  %v783_v2 = vpop.f32.mrf.mxu3 }
 0x1b6   :  { %v623_v3 = vadd.f32 %v622_v1, %v1291_v38  ;;  %893 = vst [vmem:[#allocation2 + $0x220] sm:$0xff] %v462_v0 }
 0x1b8   :  { %v784_v4 = vadd.f32 %v783_v2, %v623_v3 }
 0x1b9   :  { %v303_v5 = vpop.f32.mrf.mxu0 }
 0x1ba   :  { %894 = vst [vmem:[#allocation2 + $0x228] sm:$0xff] %v784_v4  ;;  %v304_v6 = vadd.f32 %v303_v5, %v1282_v33 }
 0x1bb   :  { %v464_v7 = vpop.f32.mrf.mxu1 }
 0x1bc   :  { %v465_v8 = vadd.f32 %v464_v7, %v304_v6 }
 0x1bd   :  { %v625_v9 = vpop.f32.mrf.mxu2  ;;  %v786_v10 = vpop.f32.mrf.mxu3 }
 0x1be   :  { %v626_v11 = vadd.f32 %v625_v9, %v1291_v38  ;;  %895 = vst [vmem:[#allocation2 + $0x230] sm:$0xff] %v465_v8 }
 0x1c0   :  { %v787_v12 = vadd.f32 %v786_v10, %v626_v11 }
 0x1c1   :  { %v306_v13 = vpop.f32.mrf.mxu0 }
 0x1c2   :  { %896 = vst [vmem:[#allocation2 + $0x238] sm:$0xff] %v787_v12  ;;  %v307_v14 = vadd.f32 %v306_v13, %v1282_v33 }
 0x1c3   :  { %v467_v15 = vpop.f32.mrf.mxu1 }
 0x1c4   :  { %v468_v16 = vadd.f32 %v467_v15, %v307_v14 }
 0x1c5   :  { %v628_v17 = vpop.f32.mrf.mxu2  ;;  %v789_v18 = vpop.f32.mrf.mxu3 }
 0x1c6   :  { %v629_v19 = vadd.f32 %v628_v17, %v1291_v38  ;;  %897 = vst [vmem:[#allocation2 + $0x240] sm:$0xff] %v468_v16 }
 0x1c8   :  { %v790_v20 = vadd.f32 %v789_v18, %v629_v19 }
 0x1c9   :  { %v309_v21 = vpop.f32.mrf.mxu0 }
 0x1ca   :  { %898 = vst [vmem:[#allocation2 + $0x248] sm:$0xff] %v790_v20  ;;  %v310_v22 = vadd.f32 %v309_v21, %v1282_v33 }
 0x1cb   :  { %v470_v23 = vpop.f32.mrf.mxu1 }
 0x1cc   :  { %v471_v24 = vadd.f32 %v470_v23, %v310_v22 }
 0x1cd   :  { %v631_v25 = vpop.f32.mrf.mxu2  ;;  %v792_v26 = vpop.f32.mrf.mxu3 }
 0x1ce   :  { %v632_v27 = vadd.f32 %v631_v25, %v1291_v38  ;;  %899 = vst [vmem:[#allocation2 + $0x250] sm:$0xff] %v471_v24 }
 0x1d0   :  { %v793_v28 = vadd.f32 %v792_v26, %v632_v27 }
 0x1d1   :  { %v312_v29 = vpop.f32.mrf.mxu0 }
 0x1d2   :  { %900 = vst [vmem:[#allocation2 + $0x258] sm:$0xff] %v793_v28  ;;  %v313_v30 = vadd.f32 %v312_v29, %v1282_v33 }
 0x1d3   :  { %v473_v31 = vpop.f32.mrf.mxu1 }
 0x1d4   :  { %v474_v32 = vadd.f32 %v473_v31, %v313_v30 }
 0x1d5   :  { %v634_v34 = vpop.f32.mrf.mxu2  ;;  %v795_v35 = vpop.f32.mrf.mxu3 }
 0x1d6   :  { %v635_v36 = vadd.f32 %v634_v34, %v1291_v38  ;;  %901 = vst [vmem:[#allocation2 + $0x260] sm:$0xff] %v474_v32 }
 0x1d8   :  { %v796_v37 = vadd.f32 %v795_v35, %v635_v36 }
 0x1d9   :  { %v315_v39 = vpop.f32.mrf.mxu0 }
 0x1da   :  { %902 = vst [vmem:[#allocation2 + $0x268] sm:$0xff] %v796_v37  ;;  %v316_v40 = vadd.f32 %v315_v39, %v1282_v33 }
 0x1db   :  { %v476_v41 = vpop.f32.mrf.mxu1 }
 0x1dc   :  { %v477_v42 = vadd.f32 %v476_v41, %v316_v40 }
 0x1dd   :  { %v637_v43 = vpop.f32.mrf.mxu2  ;;  %v798_v44 = vpop.f32.mrf.mxu3 }
 0x1de   :  { %v638_v45 = vadd.f32 %v637_v43, %v1291_v38  ;;  %903 = vst [vmem:[#allocation2 + $0x270] sm:$0xff] %v477_v42 }
 0x1e0   :  { %v799_v46 = vadd.f32 %v798_v44, %v638_v45 }
 0x1e1   :  { %v318_v47 = vpop.f32.mrf.mxu0 }
 0x1e2   :  { %904 = vst [vmem:[#allocation2 + $0x278] sm:$0xff] %v799_v46  ;;  %v319_v48 = vadd.f32 %v318_v47, %v1282_v33 }
 0x1e3   :  { %v479_v49 = vpop.f32.mrf.mxu1 }
 0x1e4   :  { %v480_v50 = vadd.f32 %v479_v49, %v319_v48 }
 0x1e5   :  { %v640_v51 = vpop.f32.mrf.mxu2  ;;  %v801_v52 = vpop.f32.mrf.mxu3 }
 0x1e6   :  { %v641_v53 = vadd.f32 %v640_v51, %v1291_v38  ;;  %905 = vst [vmem:[#allocation2 + $0x280] sm:$0xff] %v480_v50 }
 0x1e8   :  { %v802_v54 = vadd.f32 %v801_v52, %v641_v53 }
 0x1e9   :  { %v321_v55 = vpop.f32.mrf.mxu0 }
 0x1ea   :  { %906 = vst [vmem:[#allocation2 + $0x288] sm:$0xff] %v802_v54  ;;  %v322_v56 = vadd.f32 %v321_v55, %v1282_v33 }
 0x1eb   :  { %v482_v57 = vpop.f32.mrf.mxu1 }
 0x1ec   :  { %v483_v58 = vadd.f32 %v482_v57, %v322_v56 }
 0x1ed   :  { %v643_v59 = vpop.f32.mrf.mxu2  ;;  %v804_v60 = vpop.f32.mrf.mxu3 }
 0x1ee   :  { %v644_v61 = vadd.f32 %v643_v59, %v1291_v38  ;;  %907 = vst [vmem:[#allocation2 + $0x290] sm:$0xff] %v483_v58 }
 0x1f0   :  { %v805_v62 = vadd.f32 %v804_v60, %v644_v61 }
 0x1f1   :  { %v324_v63 = vpop.f32.mrf.mxu0 }
 0x1f2   :  { %908 = vst [vmem:[#allocation2 + $0x298] sm:$0xff] %v805_v62  ;;  %v325_v0 = vadd.f32 %v324_v63, %v1282_v33 }
 0x1f3   :  { %v485_v1 = vpop.f32.mrf.mxu1 }
 0x1f4   :  { %v486_v2 = vadd.f32 %v485_v1, %v325_v0 }
 0x1f5   :  { %v646_v3 = vpop.f32.mrf.mxu2  ;;  %v807_v4 = vpop.f32.mrf.mxu3 }
 0x1f6   :  { %v647_v5 = vadd.f32 %v646_v3, %v1291_v38  ;;  %909 = vst [vmem:[#allocation2 + $0x2a0] sm:$0xff] %v486_v2 }
 0x1f8   :  { %v808_v6 = vadd.f32 %v807_v4, %v647_v5 }
 0x1f9   :  { %v327_v7 = vpop.f32.mrf.mxu0 }
 0x1fa   :  { %910 = vst [vmem:[#allocation2 + $0x2a8] sm:$0xff] %v808_v6  ;;  %v328_v8 = vadd.f32 %v327_v7, %v1282_v33 }
 0x1fb   :  { %v488_v9 = vpop.f32.mrf.mxu1 }
 0x1fc   :  { %v489_v10 = vadd.f32 %v488_v9, %v328_v8 }
 0x1fd   :  { %v649_v11 = vpop.f32.mrf.mxu2  ;;  %v810_v12 = vpop.f32.mrf.mxu3 }
 0x1fe   :  { %v650_v13 = vadd.f32 %v649_v11, %v1291_v38  ;;  %911 = vst [vmem:[#allocation2 + $0x2b0] sm:$0xff] %v489_v10 }
 0x200   :  { %v811_v14 = vadd.f32 %v810_v12, %v650_v13 }
 0x201   :  { %v330_v15 = vpop.f32.mrf.mxu0 }
 0x202   :  { %912 = vst [vmem:[#allocation2 + $0x2b8] sm:$0xff] %v811_v14  ;;  %v331_v16 = vadd.f32 %v330_v15, %v1282_v33 }
 0x203   :  { %v491_v17 = vpop.f32.mrf.mxu1 }
 0x204   :  { %v492_v18 = vadd.f32 %v491_v17, %v331_v16 }
 0x205   :  { %v652_v19 = vpop.f32.mrf.mxu2  ;;  %v813_v20 = vpop.f32.mrf.mxu3 }
 0x206   :  { %v653_v21 = vadd.f32 %v652_v19, %v1291_v38  ;;  %913 = vst [vmem:[#allocation2 + $0x2c0] sm:$0xff] %v492_v18 }
 0x208   :  { %v814_v22 = vadd.f32 %v813_v20, %v653_v21 }
 0x209   :  { %v333_v23 = vpop.f32.mrf.mxu0 }
 0x20a   :  { %914 = vst [vmem:[#allocation2 + $0x2c8] sm:$0xff] %v814_v22  ;;  %v334_v24 = vadd.f32 %v333_v23, %v1282_v33 }
 0x20b   :  { %v494_v25 = vpop.f32.mrf.mxu1 }
 0x20c   :  { %v495_v26 = vadd.f32 %v494_v25, %v334_v24 }
 0x20d   :  { %v655_v27 = vpop.f32.mrf.mxu2  ;;  %v816_v28 = vpop.f32.mrf.mxu3 }
 0x20e   :  { %v656_v29 = vadd.f32 %v655_v27, %v1291_v38  ;;  %915 = vst [vmem:[#allocation2 + $0x2d0] sm:$0xff] %v495_v26 }
 0x210   :  { %v817_v30 = vadd.f32 %v816_v28, %v656_v29 }
 0x211   :  { %v336_v31 = vpop.f32.mrf.mxu0 }
 0x212   :  { %916 = vst [vmem:[#allocation2 + $0x2d8] sm:$0xff] %v817_v30  ;;  %v337_v32 = vadd.f32 %v336_v31, %v1282_v33 }
 0x213   :  { %v497_v34 = vpop.f32.mrf.mxu1 }
 0x214   :  { %v498_v35 = vadd.f32 %v497_v34, %v337_v32 }
 0x215   :  { %v658_v36 = vpop.f32.mrf.mxu2  ;;  %v819_v37 = vpop.f32.mrf.mxu3 }
 0x216   :  { %v659_v39 = vadd.f32 %v658_v36, %v1291_v38  ;;  %917 = vst [vmem:[#allocation2 + $0x2e0] sm:$0xff] %v498_v35 }
 0x218   :  { %v820_v40 = vadd.f32 %v819_v37, %v659_v39 }
 0x219   :  { %v339_v41 = vpop.f32.mrf.mxu0 }
 0x21a   :  { %918 = vst [vmem:[#allocation2 + $0x2e8] sm:$0xff] %v820_v40  ;;  %v340_v42 = vadd.f32 %v339_v41, %v1282_v33 }
 0x21b   :  { %v500_v43 = vpop.f32.mrf.mxu1 }
 0x21c   :  { %v501_v44 = vadd.f32 %v500_v43, %v340_v42 }
 0x21d   :  { %v661_v45 = vpop.f32.mrf.mxu2  ;;  %v822_v46 = vpop.f32.mrf.mxu3 }
 0x21e   :  { %v662_v47 = vadd.f32 %v661_v45, %v1291_v38  ;;  %919 = vst [vmem:[#allocation2 + $0x2f0] sm:$0xff] %v501_v44 }
 0x220   :  { %v823_v48 = vadd.f32 %v822_v46, %v662_v47 }
 0x222   :  { %920 = vst [vmem:[#allocation2 + $0x2f8] sm:$0xff] %v823_v48 }
 0x223   :  { %933 = dma.vmem_to_hbm [thread:$0]  %s926_s25, 12288, %s928_s28, [#allocation3], %s969_s29, %s969_s29, %s970_s30  }
 0x224   :  { %966 = dma.done.wait [#allocation3], 12288  }
 0x225   :  { %967 = vsyncadd [#allocation3], 4294955008 }
 0x226   :  { %938 = vsyncpa [#allocation3], 1 }

</bundles_post_ra>
